<compile_context>
chip_gen: v5e
topology: v5e:2x2
jax: 0.10.0
libtpu: 0.0.40
codegen_flags: <defaults>
</compile_context>

<pallas_src>
import jax
import jax.numpy as jnp
from jax.experimental import pallas as pl
from jax.experimental.pallas import tpu as pltpu

BN_EPS = 1e-5        # PyTorch BatchNorm1d default eps
_LANE = 128          # TPU lane width
_SUBLANE = 8         # f32 sublane width


# ---------------------------------------------------------------------------
# Kernels
# ---------------------------------------------------------------------------
def _pool_linear_kernel(f_ref, w_ref, b_ref, y_ref, acc_ref):
    """Stream (bt, hwt, C) feature tiles; accumulate the spatial SUM into a resident
    f32 scratch; on the last hw step apply sum @ (W.T/HW) + b (lane-dense Epad).
    The 1/HW scale is pre-folded into w_ref."""
    h = pl.program_id(1)

    @pl.when(h == 0)
    def _init():
        acc_ref[...] = jnp.zeros_like(acc_ref)

    # Pure add-reduce over the streamed spatial tile; f32 accumulation regardless of
    # the streamed dtype (bf16 trunks stream as bf16).
    # TODO(synk): on v5e (no bf16 VPU) verify this reduce does not materialize a full
    # f32 upcast copy of the block; if it does, chunk over sublanes with fori_loop.
    acc_ref[...] += jnp.sum(f_ref[...], axis=1, dtype=jnp.float32)

    @pl.when(h == pl.num_programs(1) - 1)
    def _finalize():
        y = jnp.dot(acc_ref[...].astype(w_ref.dtype), w_ref[...],
                    preferred_element_type=jnp.float32)
        y_ref[...] = y + b_ref[...]


def _pool_linear_bn_kernel(f_ref, w_ref, b_ref, g_ref, be_ref, o_ref, acc_ref):
    """Fused variant used when the whole batch is resident in one block
    (batch_tile == B): the train-mode BatchNorm1d runs inside the finalize, so no
    second pallas_call / HBM round trip is needed."""
    h = pl.program_id(1)

    @pl.when(h == 0)
    def _init():
        acc_ref[...] = jnp.zeros_like(acc_ref)

    acc_ref[...] += jnp.sum(f_ref[...], axis=1, dtype=jnp.float32)

    @pl.when(h == pl.num_programs(1) - 1)
    def _finalize():
        y = jnp.dot(acc_ref[...].astype(w_ref.dtype), w_ref[...],
                    preferred_element_type=jnp.float32) + b_ref[...]
        mu = jnp.mean(y, axis=0, keepdims=True)
        var = jnp.mean((y - mu) ** 2, axis=0, keepdims=True)      # biased batch var
        o_ref[...] = (y - mu) * jax.lax.rsqrt(var + BN_EPS) * g_ref[...] + be_ref[...]


def _batchnorm_kernel(y_ref, gamma_ref, beta_ref, o_ref):
    """Train-mode BatchNorm1d over the FULL batch on the tiny resident (B, Epad) slab.
    (Note: B=1 gives var=0 -> rsqrt(eps); PyTorch would raise in that case.)"""
    y = y_ref[...]
    mu = jnp.mean(y, axis=0, keepdims=True)
    var = jnp.mean((y - mu) ** 2, axis=0, keepdims=True)
    o_ref[...] = (y - mu) * jax.lax.rsqrt(var + BN_EPS) * gamma_ref[...] + beta_ref[...]


# ---------------------------------------------------------------------------
# Parameter preparation (one-time, hoisted out of the per-call path)
# ---------------------------------------------------------------------------
def _round_up(x, m):
    return (x + m - 1) // m * m


def prepare_encoder_params(weight, bias, gamma, beta, hw,
                           *, compute_dtype=jnp.bfloat16):
    """One-time prep: transpose+pad the PyTorch (E, C) linear weight to a lane-dense
    (C, Epad) matrix, fold the 1/HW average-pool scale into it, and cast to the MXU
    compute dtype (bf16 by default). Bias / BN affine params are padded to Epad."""
    E, C = weight.shape
    Epad = _round_up(E, _LANE)
    w_scaled = (weight.astype(jnp.float32).T * (1.0 / hw)).astype(compute_dtype)
    w_t = jnp.zeros((C, Epad), compute_dtype).at[:, :E].set(w_scaled)
    b2 = jnp.zeros((1, Epad), jnp.float32).at[:, :E].set(bias.astype(jnp.float32))
    g2 = jnp.zeros((1, Epad), jnp.float32).at[:, :E].set(gamma.astype(jnp.float32))
    be2 = jnp.zeros((1, Epad), jnp.float32).at[:, :E].set(beta.astype(jnp.float32))
    return {"w_t": w_t, "b": b2, "gamma": g2, "beta": be2,
            "embed_size": E, "hw": hw}


# ---------------------------------------------------------------------------
# Tiling heuristic
# ---------------------------------------------------------------------------
def _choose_tiles(B, HW, C, itemsize, budget_bytes=4 << 20):
    """Pick (batch_tile, hw_tile) so that:
       * the streamed block bt*hwt*C*itemsize honors the VMEM budget using the REAL
         block bytes (works even when HW has no multiple-of-8 divisor, e.g. HW=49),
       * the batch grid axis has >= 2 blocks when possible (v7x megacore sharding),
       * there are >= 4 total grid steps when possible (hide the DMA prologue;
         per-step overhead is only ~0.35 us),
       * subject to the above, blocks are as large as possible.
       bt is a multiple of 8 (or B itself) so the (bt, Epad) output block satisfies
       the (8,128) layout constraint."""
    hw_divs = sorted({d for d in range(_SUBLANE, HW + 1, _SUBLANE) if HW % d == 0}
                     | {HW})
    bt_divs = sorted({d for d in range(_SUBLANE, B + 1, _SUBLANE) if B % d == 0}
                     | {B})

    best = None
    for bt in bt_divs:
        for hwt in hw_divs:
            blk_bytes = bt * hwt * C * itemsize
            batch_blocks = B // bt
            steps = batch_blocks * (HW // hwt)
            key = (
                blk_bytes <= budget_bytes,           # must fit the VMEM budget
                batch_blocks >= 2 or B == 1,         # megacore gets >= 2 batch blocks
                steps >= 4,                          # enough steps to hide prologue
                -steps,                              # ...but no more than needed
                bt * hwt,                            # prefer bigger blocks (tie-break)
            )
            if best is None or key > best[0]:
                best = (key, bt, hwt)
    return best[1], best[2]


# ---------------------------------------------------------------------------
# Forward wrapper
# ---------------------------------------------------------------------------
def encoder_forward(features_nhwc, params, *, batch_tile=None, hw_tile=None):
    """features_nhwc: (B, H, W, C) trunk output (channels-last -> free reshape).
       params: output of prepare_encoder_params.  Returns (B, E) float32."""
    B, H, W, C = features_nhwc.shape
    HW = H * W
    assert params["hw"] == HW, "params were prepared for a different spatial size"
    w_t, b2, g2, be2 = params["w_t"], params["b"], params["gamma"], params["beta"]
    E = params["embed_size"]
    Epad = w_t.shape[1]
    assert w_t.shape[0] == C

    f = features_nhwc.reshape(B, HW, C)          # contiguous view, no HBM transpose

    bt, hwt = _choose_tiles(B, HW, C, f.dtype.itemsize)
    if batch_tile is not None:
        bt = batch_tile
    if hw_tile is not None:
        hwt = hw_tile
    assert B % bt == 0 and HW % hwt == 0, "tiles must divide (B, H*W)"
    assert bt == B or bt % _SUBLANE == 0, "batch tile must be a multiple of 8 or B"
    assert hwt == HW or hwt % _SUBLANE == 0, "hw tile must be a multiple of 8 or HW"

    grid = (B // bt, HW // hwt)                  # reduction (hw) axis last

    cost = pl.CostEstimate(
        flops=2 * B * HW * C + 2 * B * C * Epad,
        transcendentals=0,
        bytes_accessed=(B * HW * C * f.dtype.itemsize
                        + C * Epad * w_t.dtype.itemsize
                        + B * Epad * 4),
    )
    cparams = pltpu.CompilerParams(
        dimension_semantics=("parallel", "arbitrary"),
        vmem_limit_bytes=32 * 1024 * 1024,
    )

    feat_spec = pl.BlockSpec((bt, hwt, C), lambda b, h: (b, h, 0))
    # Constant-index parameter blocks: a second pipeline buffer is pure waste.
    w_spec = pl.BlockSpec((C, Epad), lambda b, h: (0, 0),
                          pipeline_mode=pl.Buffered(1))
    b_spec = pl.BlockSpec((1, Epad), lambda b, h: (0, 0),
                          pipeline_mode=pl.Buffered(1))
    out_spec = pl.BlockSpec((bt, Epad), lambda b, h: (b, 0))

    if bt == B:
        # Whole batch resident in the finalize -> fuse BatchNorm1d, single launch.
        out_padded = pl.pallas_call(
            _pool_linear_bn_kernel,
            out_shape=jax.ShapeDtypeStruct((B, Epad), jnp.float32),
            grid=grid,
            in_specs=[
                feat_spec,
                w_spec,
                b_spec,
                pl.BlockSpec((1, Epad), lambda b, h: (0, 0)),
                pl.BlockSpec((1, Epad), lambda b, h: (0, 0)),
            ],
            out_specs=out_spec,
            scratch_shapes=[pltpu.VMEM((bt, C), jnp.float32)],
            compiler_params=cparams,
            cost_estimate=cost,
        )(f, w_t, b2, g2, be2)
    else:
        # Phase 1: pipelined streaming pool + lane-dense Linear (per batch tile).
        y_padded = pl.pallas_call(
            _pool_linear_kernel,
            out_shape=jax.ShapeDtypeStruct((B, Epad), jnp.float32),
            grid=grid,
            in_specs=[feat_spec, w_spec, b_spec],
            out_specs=out_spec,
            scratch_shapes=[pltpu.VMEM((bt, C), jnp.float32)],
            compiler_params=cparams,
            cost_estimate=cost,
        )(f, w_t, b2)

        # Phase 2: BatchNorm1d over the FULL batch (tiny (B, Epad) block), kept as a
        # separate micro-kernel so batch tiling / megacore sharding above can never
        # change the BN statistics.
        out_padded = pl.pallas_call(
            _batchnorm_kernel,
            out_shape=jax.ShapeDtypeStruct((B, Epad), jnp.float32),
            grid=(1,),
            in_specs=[
                pl.BlockSpec((B, Epad), lambda i: (0, 0)),
                pl.BlockSpec((1, Epad), lambda i: (0, 0)),
                pl.BlockSpec((1, Epad), lambda i: (0, 0)),
            ],
            out_specs=pl.BlockSpec((B, Epad), lambda i: (0, 0)),
            compiler_params=pltpu.CompilerParams(
                dimension_semantics=("arbitrary",)),
        )(y_padded, g2, be2)

    return out_padded[:, :E]


# ---------------------------------------------------------------------------
# Reference + test
# ---------------------------------------------------------------------------
def _reference(features_nhwc, weight, bias, gamma, beta):
    pooled = jnp.mean(features_nhwc.astype(jnp.float32), axis=(1, 2))   # (B, C)
    y = pooled @ weight.T + bias
    mu = jnp.mean(y, axis=0, keepdims=True)
    var = jnp.mean((y - mu) ** 2, axis=0, keepdims=True)
    return (y - mu) / jnp.sqrt(var + BN_EPS) * gamma + beta


if __name__ == "__main__":
    # Small synthetic shapes: B=16 batch, C=256 trunk channels (stands in for 2048),
    # 4x4 pre-pool spatial map (NHWC), embed_size=32 (padded to 128 inside).
    B, C, H, W, E = 16, 256, 4, 4, 32

    key = jax.random.PRNGKey(0)
    k_feat, k_w, k_b = jax.random.split(key, 3)

    features = jax.random.normal(k_feat, (B, H, W, C), dtype=jnp.float32)

    # Deterministic parameter init matching nn.Linear defaults: U(-1/sqrt(C), 1/sqrt(C)).
    bound = 1.0 / (C ** 0.5)
    weight = jax.random.uniform(k_w, (E, C), minval=-bound, maxval=bound,
                                dtype=jnp.float32)
    bias = jax.random.uniform(k_b, (E,), minval=-bound, maxval=bound,
                              dtype=jnp.float32)
    gamma = jnp.ones((E,), dtype=jnp.float32)   # BatchNorm1d affine defaults
    beta = jnp.zeros((E,), dtype=jnp.float32)

    ref = _reference(features, weight, bias, gamma, beta)

    # Run 1: default path -- one-time bf16 param prep, auto tiles (>=2 batch blocks,
    # >=4 grid steps), separate full-batch BN micro-kernel.
    params_bf16 = prepare_encoder_params(weight, bias, gamma, beta, hw=H * W,
                                         compute_dtype=jnp.bfloat16)
    out1 = encoder_forward(features, params_bf16)
    out1 = jax.block_until_ready(out1)
    assert out1.shape == (B, E)
    assert jnp.allclose(out1, ref, atol=2e-2, rtol=2e-2), "bf16 path mismatch vs ref"

    # Run 2: f32 params, batch_tile=B (whole batch resident) + hw_tile=8 -> grid (1, 2):
    # exercises the hw-reduction accumulator AND the fused-BatchNorm finalize path.
    params_f32 = prepare_encoder_params(weight, bias, gamma, beta, hw=H * W,
                                        compute_dtype=jnp.float32)
    out2 = encoder_forward(features, params_f32, batch_tile=B, hw_tile=8)
    out2 = jax.block_until_ready(out2)
    assert out2.shape == (B, E)
    assert jnp.allclose(out2, ref, atol=1e-4, rtol=1e-4), "f32 fused path mismatch vs ref"

    print("KERNEL_OK")
</pallas_src>

<mosaic_0001>
module attributes {stable_mosaic.version = 11 : i64} {
  func.func @_pool_linear_kernel(%arg0: i32, %arg1: i32, %arg2: memref<8x8x256xf32, #tpu.memory_space<vmem>>, %arg3: memref<256x128xbf16, #tpu.memory_space<vmem>>, %arg4: memref<1x128xf32, #tpu.memory_space<vmem>>, %arg5: memref<8x128xf32, #tpu.memory_space<vmem>>, %arg6: memref<8x256xf32, #tpu.memory_space<vmem>>) attributes {dimension_semantics = [#tpu.dimension_semantics<parallel>, #tpu.dimension_semantics<arbitrary>], iteration_bounds = array<i64: 2, 2>, scalar_prefetch = 0 : i64, scratch_operands = 1 : i64, tpu.core_type = #tpu.core_type<tc>, window_params = [{transform_indices = @transform_0, window_bounds = array<i64: 8, 8, 256>}, {pipeline_mode = #tpu.pipeline_mode<synchronous>, transform_indices = @transform_1, window_bounds = array<i64: 256, 128>}, {pipeline_mode = #tpu.pipeline_mode<synchronous>, transform_indices = @transform_2, window_bounds = array<i64: 1, 128>}, {transform_indices = @transform_3, window_bounds = array<i64: 8, 128>}]} {
    %c0_i32 = arith.constant 0 : i32
    %0 = arith.cmpi eq, %arg1, %c0_i32 : i32
    %1 = arith.extui %0 : i1 to i32
    %c0_i32_0 = arith.constant 0 : i32
    %2 = arith.cmpi ne, %1, %c0_i32_0 : i32
    scf.if %2 {
      %cst_8 = arith.constant 0.000000e+00 : f32
      %11 = vector.broadcast %cst_8 : f32 to vector<8x256xf32>
      %c0_9 = arith.constant 0 : index
      %c0_10 = arith.constant 0 : index
      %12 = vector.load %arg6[%c0_9, %c0_10] : memref<8x256xf32, #tpu.memory_space<vmem>>, vector<8x256xf32>
      tpu.vector_store %arg6[%c0_9, %c0_10], %11 {strides = array<i32>} : memref<8x256xf32, #tpu.memory_space<vmem>>, vector<8x256xf32>,
    } else {
    }
    %c0 = arith.constant 0 : index
    %c0_1 = arith.constant 0 : index
    %3 = vector.load %arg6[%c0, %c0_1] : memref<8x256xf32, #tpu.memory_space<vmem>>, vector<8x256xf32>
    %c0_2 = arith.constant 0 : index
    %c0_3 = arith.constant 0 : index
    %c0_4 = arith.constant 0 : index
    %4 = vector.load %arg2[%c0_2, %c0_3, %c0_4] : memref<8x8x256xf32, #tpu.memory_space<vmem>>, vector<8x8x256xf32>
    %cst = arith.constant dense<0.000000e+00> : vector<8x256xf32>
    %5 = vector.multi_reduction <add>, %4, %cst [1] : vector<8x8x256xf32> to vector<8x256xf32>
    %6 = arith.addf %3, %5 : vector<8x256xf32>
    %c0_5 = arith.constant 0 : index
    %c0_6 = arith.constant 0 : index
    %7 = vector.load %arg6[%c0_5, %c0_6] : memref<8x256xf32, #tpu.memory_space<vmem>>, vector<8x256xf32>
    tpu.vector_store %arg6[%c0_5, %c0_6], %6 {strides = array<i32>} : memref<8x256xf32, #tpu.memory_space<vmem>>, vector<8x256xf32>,
    %c1_i32 = arith.constant 1 : i32
    %8 = arith.cmpi eq, %arg1, %c1_i32 : i32
    %9 = arith.extui %8 : i1 to i32
    %c0_i32_7 = arith.constant 0 : i32
    %10 = arith.cmpi ne, %9, %c0_i32_7 : i32
    scf.if %10 {
      %c0_8 = arith.constant 0 : index
      %c0_9 = arith.constant 0 : index
      %11 = vector.load %arg6[%c0_8, %c0_9] : memref<8x256xf32, #tpu.memory_space<vmem>>, vector<8x256xf32>
      %12 = arith.truncf %11 : vector<8x256xf32> to vector<8x256xbf16>
      %c0_10 = arith.constant 0 : index
      %c0_11 = arith.constant 0 : index
      %13 = vector.load %arg3[%c0_10, %c0_11] : memref<256x128xbf16, #tpu.memory_space<vmem>>, vector<256x128xbf16>
      %cst_12 = arith.constant dense<0.000000e+00> : vector<8x128xf32>
      %14 = tpu.matmul %12, %13, %cst_12 {dimension_numbers = #tpu.dot_dimension_numbers<[1], [0], [0], [1], [0, 0, 1, 1], [], []>} : vector<8x256xbf16>, vector<256x128xbf16>, vector<8x128xf32> -> vector<8x128xf32>
      %c0_13 = arith.constant 0 : index
      %c0_14 = arith.constant 0 : index
      %15 = vector.load %arg4[%c0_13, %c0_14] : memref<1x128xf32, #tpu.memory_space<vmem>>, vector<1x128xf32>
      %16 = vector.broadcast %15 : vector<1x128xf32> to vector<8x128xf32>
      %17 = arith.addf %14, %16 : vector<8x128xf32>
      %c0_15 = arith.constant 0 : index
      %c0_16 = arith.constant 0 : index
      %18 = vector.load %arg5[%c0_15, %c0_16] : memref<8x128xf32, #tpu.memory_space<vmem>>, vector<8x128xf32>
      tpu.vector_store %arg5[%c0_15, %c0_16], %17 {strides = array<i32>} : memref<8x128xf32, #tpu.memory_space<vmem>>, vector<8x128xf32>,
    } else {
    }
    return
  }
  func.func @transform_0(%arg0: i32, %arg1: i32) -> (i32, i32, i32) {
    %c0_i32 = arith.constant 0 : i32
    %c0_i32_0 = arith.constant 0 : i32
    return %arg0, %arg1, %c0_i32 : i32, i32, i32
  }
  func.func @transform_1(%arg0: i32, %arg1: i32) -> (i32, i32) {
    %c0_i32 = arith.constant 0 : i32
    %c0_i32_0 = arith.constant 0 : i32
    %c0_i32_1 = arith.constant 0 : i32
    return %c0_i32, %c0_i32_0 : i32, i32
  }
  func.func @transform_2(%arg0: i32, %arg1: i32) -> (i32, i32) {
    %c0_i32 = arith.constant 0 : i32
    %c0_i32_0 = arith.constant 0 : i32
    %c0_i32_1 = arith.constant 0 : i32
    return %c0_i32, %c0_i32_0 : i32, i32
  }
  func.func @transform_3(%arg0: i32, %arg1: i32) -> (i32, i32) {
    %c0_i32 = arith.constant 0 : i32
    %c0_i32_0 = arith.constant 0 : i32
    return %arg0, %c0_i32 : i32, i32
  }
}

</mosaic_0001>

<bundles_post_ra>
// kernel: tpu_custom_call.1
= control target key start
LH: loop header
LB: loop body
LE: loop exit
PB: predicated region body
PF: predicated region fallthrough
CT: control target
= control target key end

     0   :  { %s1354_s0 = inlined_call_operand.hbm [shape: f32[16,16,256], index: 0, kind: input, shape index: {}]   ;;  %s1355_s1 = inlined_call_operand.hbm [shape: bf16[256,128], index: 1, kind: input, shape index: {}]   ;;  %s1356_s2 = inlined_call_operand.vmem [shape: f32[1,128], index: 2, kind: input, shape index: {}]   ;;  %s1357_s3 = inlined_call_operand.hbm [shape: f32[16,128], index: 3, kind: output, shape index: {}]  }
   0x1   :  { %1366 = sst [smem:[#allocation19_spill]] %s1355_s1 }
   0x2   :  { %1367 = sst [smem:[#allocation20_spill]] %s1357_s3 }
   0x3   :  { %8 = vsyncpa [#allocation4], 0 }
   0x4   :  { %10 = vsyncpa [#allocation4 + $0x1], 0 }
   0x5   :  { %11 = vsyncpa [#allocation7], 0 }
   0x6   :  { %12 = vsyncpa [#allocation5], 0 }
   0x7   :  { %14 = vsyncpa [#allocation5 + $0x1], 0  ;;  %s1102_s12 = smov 0   ;;  %s1104_s13 = smov 0  }
   0x8   :  { %s1106_s14 = smov 0   ;;  %s1108_s15 = smov 0  }
   0x9   :  { %s1110_s16 = smov 0   ;;  %s1112_s17 = smov 0  }
   0xa   :  { %s1114_s18 = smov 0   ;;  %s1116_s19 = smov 0  }
   0xb   :  { %s1118_s20 = smov 0   ;;  %s1120_s21 = smov 0  }
   0xc   :  { %s1122_s22 = smov 0  }
   0xd LB: > { %1368 = sst [smem:[#allocation12_spill]] %s1033_s12  ;;  %s666_s23 = sadd.s32 4294967295, %s1073_s22   ;;  %s1073_s22 = sphi %s1122_s22, %s20_s22   ;;  %s1069_s21 = sphi %s1120_s21, %s1397_s21   ;;  %s1065_s20 = sphi %s1118_s20, %s1388_s20   ;;  %s1061_s19 = sphi %s1116_s19, %s1396_s19   ;;  %s1057_s18 = sphi %s1114_s18, %s1387_s18   ;;  %s1053_s17 = sphi %s1112_s17, %s1395_s17   ;;  %s1049_s16 = sphi %s1110_s16, %s1394_s16   ;;  %s1045_s15 = sphi %s1108_s15, %s1393_s15   ;;  %s1041_s14 = sphi %s1106_s14, %s1392_s14   ;;  %s1037_s13 = sphi %s1104_s13, %s1391_s13   ;;  %s1033_s12 = sphi %s1102_s12, %s1390_s12  }
   0xe   : > { %1369 = sst [smem:[#allocation13_spill]] %s1061_s19  ;;  %s667_s24 = sadd.s32 4294967294, %s1073_s22  }
   0xf   : > { %1370 = sst [smem:[#allocation14_spill]] %s1065_s20  ;;  %p54_p0 = scmp.ne.s32.totalorder %s1049_s16, %s1045_s15 }
  0x10   : > { %p1158_p1 = scmp.eq.s32.totalorder %s666_s23, 0  ;;  %s109_s26 = sadd.s32 1, %s1041_s14 }
  0x11   : > { %p119_p2 = scmp.ne.s32.totalorder %s1041_s14, %s1037_s13  ;;  %p120_p4 = scmp.eq.s32.totalorder %s666_s23, 3 }
  0x12   : > { %p1167_p3 = por %p1158_p1, %p54_p0  ;;  %p125_p5 = scmp.ne.s32.totalorder %s1037_s13, %s1033_s12 }
  0x13   : > { %p126_p6 = scmp.eq.s32.totalorder %s667_s24, 3  ;;  %p1173_p7 = por %p120_p4, %p119_p2 }
  0x14   : > { %p668_p8 = scmp.ge.s32.totalorder %s1073_s22, 1  ;;  %p133_p10 = scmp.lt.s32.totalorder %s1073_s22, 5 }
  0x15   : > { %s1373_s28 = scalar_select %p1173_p7, 1, 0 }
  0x16   : > { %p1178_p9 = por %p126_p6, %p125_p5  ;;  %s1377_s1 = sld [smem:[#allocation19_spill]] }
  0x17   : > { %1374 = sst [smem:[#allocation15_spill]] %s1373_s28  ;;  %p1186_p11 = pnand %p668_p8, %p133_p10 }
  0x18   : > { %s1375_s29 = scalar_select %p1178_p9, 1, 0 }
  0x19   : > { %p775_p12 = pneg %p1186_p11  ;;  %s1075_s7 = smov [#allocation6]  }
  0x1a   : > { %1376 = sst [smem:[#allocation16_spill]] %s1375_s29  ;;  %s146_s8 = sshll.u32 %s1075_s7, 4  ;;  %s147_s8 = int_to_ptr.vmem [resolvable:$true] %s146_s8 }
  0x1b   : > { %p776_p13 = pnand %p775_p12, %p1158_p1  ;;  %s1076_s9 = smov 64  }
  0x1c   : > { %s144_s5 = sshll.u32 %s1377_s1, 4  ;;  %s1077_s10 = smov 4   ;;  %s145_s5 = int_to_ptr.hbm [resolvable:$true] %s144_s5 }
  0x1d   : > { %778 = dma.hbm_to_vmem [thread:$0]  (!%p776_p13), %s145_s5, 2048, %s147_s8, [#allocation7], %s1076_s9, %s1076_s9, %s1077_s10  }
  0x1e   : > { %s29_s11 = sadd.s32 1, %s1065_s20  ;;  %s32_s15 = sadd.s32 1, %s1069_s21 }
  0x1f   : > { %p30_p0 = scmp.ge.s32.totalorder %s29_s11, 2  ;;  %s41_s23 = sadd.s32 1, %s1053_s17 }
  0x20   : > { %p48_p2 = scmp.ne.s32.totalorder %s1053_s17, %s1049_s16  ;;  %p49_p4 = scmp.eq.s32.totalorder %s1073_s22, 0 }
  0x21   : > { %s1399_s11 = smov (%p30_p0, %s29_s11), 0  ;;  %s1401_s15 = smov (!%p30_p0, %s32_s15), %s1069_s21 }
  0x22   : > { %1379 = sst [smem:[#allocation17_spill]] %s1399_s11  ;;  %s37_s24 = ssub.s32 %s1065_s20, %s1399_s11 }
  0x23   : > { %p34_p5 = scmp.ge.s32.totalorder %s1401_s15, 2  ;;  %p788_p6 = scmp.lt.s32.totalorder %s1073_s22, 4 }
  0x24   : > { %p1206_p8 = por %p49_p4, %p48_p2  ;;  %s163_s4 = sand.u32 1, %s1053_s17  }
  0x25   : > { %s1403_s15 = smov (%p34_p5, %s1401_s15), 0  ;;  %s671_s5 = sshll.u32 %s163_s4, 7 }
  0x26   : > { %1381 = sst [smem:[#allocation18_spill]] %s1403_s15  ;;  %s36_s7 = ssub.s32 %s1069_s21, %s1403_s15 }
  0x27   : > { %s38_s8 = sor.u32 %s37_s24, %s36_s7  ;;  %p107_p10 = scmp.eq.s32.totalorder %s36_s7, 0 }
  0x28   : > { %p39_p12 = scmp.eq.s32.totalorder %s38_s8, 0  ;;  %s673_s9 = sshll.u32 %s1065_s20, 1 }
  0x29   : > { %s1219_s10 = scalar_select %p107_p10, %s1041_s14, %s109_s26  }
  0x2a   : > { %s1222_s1 = scalar_select %p39_p12, %s1053_s17, %s41_s23  }
  0x2b   : > { %s750_s11 = sshll.u32 %s1069_s21, 5  ;;  %s167_s29 = scalar_lea.vmem [#allocation3], %s671_s5 }
  0x2c   : > { %s178_s12 = sshll.u32 %s167_s29, 4  ;;  %s173_s3 = sadd.s32 %s750_s11, %s673_s9  ;;  %s179_s12 = int_to_ptr.vmem [resolvable:$true] %s178_s12 }
  0x2d   : > { %s675_s28 = sshll.u32 %s173_s3, 3  ;;  %p780_p13 = pnand %p788_p6, %p1206_p8 }
  0x2e   : > { %s175_s24 = scalar_lea.hbm %s1354_s0, %s675_s28  ;;  %s164_s8 = scalar_lea.sflag [#allocation4], %s163_s4 }
  0x2f   : > { %s176_s7 = sshll.u32 %s175_s24, 4  ;;  %s1078_s26 = smov 512   ;;  %s177_s7 = int_to_ptr.hbm [resolvable:$true] %s176_s7 }
  0x30   : > { %s1079_s20 = smov 256   ;;  %s1080_s23 = smov 16  }
  0x31   : > { %782 = dma.hbm_to_vmem [thread:$0]  (!%p780_p13), %s177_s7, 2048, %s179_s12, %s164_s8, %s1078_s26, %s1079_s20, %s1080_s23  }
  0x32   : > { %190 = sbr.rel (%p1186_p11) target bundleno = 292 (0x124), region = 32  ;;  %s192_s3 = sand.u32 (!%p1186_p11), 1, %s1049_s16  }
  0x33   : > { %s677_s29 = sshll.u32 (!%p1186_p11), %s192_s3, 7  ;;  %s193_s11 = scalar_lea.sflag (!%p1186_p11), [#allocation4], %s192_s3 }
  0x34   : > { %s1235_s30 = scalar_lea.vmem (!%p1186_p11), [#allocation3], %s677_s29 }
  0x37   : > { %1020 = dma.done.wait (%p1167_p3), %s193_s11, 2048  }
  0x38   : > { %1022 = vsyncadd (%p1167_p3), %s193_s11, 4294965248 }
  0x39   : > { %1024 = dma.done.wait (%p1158_p1), [#allocation7], 2048  }
  0x3a   : > { %1026 = vsyncadd (%p1158_p1), [#allocation7], 4294965248  ;;  %s222_s12 = sand.u32 1, %s1037_s13   ;;  %p680_p11 = scmp.ne.s32.totalorder %s1057_s18, 0 }
  0x3b   : > { %s1248_s19 = sshll.u32 %s222_s12, 3 }
  0x3c   : > { %s224_s20 = scalar_lea.vmem [#allocation8], %s1248_s19  ;;  %229 = sbr.rel (%p680_p11) target bundleno = 68 (0x44), region = 44 }
  0x41   : > { %v1081_v0 = vmov 0.0  }
  0x42   : > { %230 = vst [vmem:[#allocation2] sm:$0xff] %v1081_v0 }
  0x43   : > { %231 = vst [vmem:[#allocation2 + $0x8] sm:$0xff] %v1081_v0 }
  0x44 PF: > { %v234_v1 = vld [vmem:[%s1235_s30] sm:$0xff]  ;;  %v235_v2 = vld [vmem:[%s1235_s30 + $0x8] sm:$0xff]  ;;  %v236_v3 = vld [vmem:[%s1235_s30 + $0x10] sm:$0xff]  ;;  %vm362_vm0 = vcmask 1041409   ;;  %vm364_vm1 = vcmask 1042434   ;;  %vm366_vm2 = vcmask 1043459  }
  0x45   : > { %v237_v4 = vld [vmem:[%s1235_s30 + $0x18] sm:$0xff]  ;;  %v250_v5 = vrot.slane %v234_v1, 4  ;;  %v238_v6 = vld [vmem:[%s1235_s30 + $0x20] sm:$0xff]  ;;  %v239_v7 = vld [vmem:[%s1235_s30 + $0x28] sm:$0xff]  ;;  %v256_v9 = vrot.slane %v235_v2, 4  ;;  %v262_v10 = vrot.slane %v236_v3, 4 }
  0x46   : > { %v240_v8 = vld [vmem:[%s1235_s30 + $0x30] sm:$0xff]  ;;  %v268_v11 = vrot.slane %v237_v4, 4  ;;  %v241_v12 = vld [vmem:[%s1235_s30 + $0x38] sm:$0xff]  ;;  %v274_v14 = vrot.slane %v238_v6, 4  ;;  %v280_v15 = vrot.slane %v239_v7, 4  ;;  %v242_v41 = vld [vmem:[%s1235_s30 + $0x40] sm:$0xff] }
  0x47   : > { %v251_v13 = vadd.f32 %v250_v5, %v234_v1  ;;  %v286_v16 = vrot.slane %v240_v8, 4  ;;  %v257_v17 = vadd.f32 %v256_v9, %v235_v2  ;;  %v263_v18 = vadd.f32 %v262_v10, %v236_v3  ;;  %v243_v45 = vld [vmem:[%s1235_s30 + $0x48] sm:$0xff]  ;;  %v244_v46 = vld [vmem:[%s1235_s30 + $0x50] sm:$0xff]  ;;  %v245_v47 = vld [vmem:[%s1235_s30 + $0x58] sm:$0xff]  ;;  %p681_p1 = scmp.ne.s32.totalorder %s1057_s18, 1 }
  0x48   : > { %v269_v19 = vadd.f32 %v268_v11, %v237_v4  ;;  %v292_v20 = vrot.slane %v241_v12, 4  ;;  %v275_v22 = vadd.f32 %v274_v14, %v238_v6  ;;  %v281_v23 = vadd.f32 %v280_v15, %v239_v7  ;;  %v246_v49 = vld [vmem:[%s1235_s30 + $0x60] sm:$0xff]  ;;  %v247_v50 = vld [vmem:[%s1235_s30 + $0x68] sm:$0xff]  ;;  %v248_v51 = vld [vmem:[%s1235_s30 + $0x70] sm:$0xff] }
  0x49   : > { %v252_v21 = vrot.slane %v251_v13, 2  ;;  %v287_v24 = vadd.f32 %v286_v16, %v240_v8  ;;  %v258_v25 = vrot.slane %v257_v17, 2  ;;  %v264_v26 = vrot.slane %v263_v18, 2  ;;  %v249_v56 = vld [vmem:[%s1235_s30 + $0x78] sm:$0xff] }
  0x4a   : > { %v270_v27 = vrot.slane %v269_v19, 2  ;;  %v293_v28 = vadd.f32 %v292_v20, %v241_v12  ;;  %v276_v30 = vrot.slane %v275_v22, 2  ;;  %v282_v31 = vrot.slane %v281_v23, 2 }
  0x4b   : > { %v253_v29 = vadd.f32 %v252_v21, %v251_v13  ;;  %v288_v32 = vrot.slane %v287_v24, 2  ;;  %v259_v33 = vadd.f32 %v258_v25, %v257_v17  ;;  %v265_v34 = vadd.f32 %v264_v26, %v263_v18 }
  0x4c   : > { %v1260_v35 = vadd.f32 %v270_v27, %v269_v19  ;;  %v294_v36 = vrot.slane %v293_v28, 2  ;;  %v277_v38 = vadd.f32 %v276_v30, %v275_v22  ;;  %v1262_v39 = vadd.f32 %v282_v31, %v281_v23 }
  0x4d   : > { %v254_v37 = vrot.slane %v253_v29, 1  ;;  %v289_v40 = vadd.f32 %v288_v32, %v287_v24  ;;  %v260_v42 = vrot.slane %v259_v33, 1  ;;  %v266_v43 = vrot.slane %v265_v34, 1 }
  0x4e   : > { %v1265_v44 = vadd.f32 %v294_v36, %v293_v28  ;;  %v278_v48 = vrot.slane %v277_v38, 1  ;;  %v272_v53 = vrot.slane %v1260_v35, 1  ;;  %v284_v54 = vrot.slane %v1262_v39, 1 }
  0x4f   : > { %v255_v52 = vadd.f32 %v254_v37, %v253_v29  ;;  %v290_v55 = vrot.slane %v289_v40, 1  ;;  %v1276_v57 = vadd.f32 %v260_v42, %v259_v33  ;;  %v267_v58 = vadd.f32 %v266_v43, %v265_v34 }
  0x50   : > { %v296_v59 = vrot.slane %v1265_v44, 1  ;;  %v298_v60 = vrot.slane %v242_v41, 4  ;;  %v279_v61 = vadd.f32 %v278_v48, %v277_v38  ;;  %v304_v62 = vrot.slane %v243_v45, 4 }
  0x51   : > { %v310_v63 = vrot.slane %v244_v46, 4  ;;  %v316_v0 = vrot.slane %v245_v47, 4  ;;  %v322_v2 = vrot.slane %v246_v49, 4  ;;  %v328_v3 = vrot.slane %v247_v50, 4 }
  0x52   : > { %v299_v1 = vadd.f32 %v298_v60, %v242_v41  ;;  %v334_v4 = vrot.slane %v248_v51, 4  ;;  %v305_v5 = vadd.f32 %v304_v62, %v243_v45  ;;  %v340_v8 = vrot.slane %v249_v56, 4 }
  0x53   : > { %v311_v6 = vadd.f32 %v310_v63, %v244_v46  ;;  %v317_v7 = vadd.f32 %v316_v0, %v245_v47  ;;  %v323_v10 = vadd.f32 %v322_v2, %v246_v49  ;;  %v329_v11 = vadd.f32 %v328_v3, %v247_v50 }
  0x54   : > { %v300_v9 = vrot.slane %v299_v1, 2  ;;  %v335_v12 = vadd.f32 %v334_v4, %v248_v51  ;;  %vm368_vm3 = vcmask 1044484   ;;  %v306_v13 = vrot.slane %v305_v5, 2 }
  0x55   : > { %v312_v14 = vrot.slane %v311_v6, 2  ;;  %v318_v15 = vrot.slane %v317_v7, 2  ;;  %v341_v16 = vadd.f32 %v340_v8, %v249_v56  ;;  %v324_v18 = vrot.slane %v323_v10, 2 }
  0x56   : > { %v301_v17 = vadd.f32 %v300_v9, %v299_v1  ;;  %v330_v19 = vrot.slane %v329_v11, 2  ;;  %v336_v20 = vrot.slane %v335_v12, 2  ;;  %v307_v21 = vadd.f32 %v306_v13, %v305_v5 }
  0x57   : > { %v313_v22 = vadd.f32 %v312_v14, %v311_v6  ;;  %v319_v23 = vadd.f32 %v318_v15, %v317_v7  ;;  %v342_v24 = vrot.slane %v341_v16, 2  ;;  %v325_v26 = vadd.f32 %v324_v18, %v323_v10 }
  0x58   : > { %v302_v25 = vrot.slane %v301_v17, 1  ;;  %v331_v27 = vadd.f32 %v330_v19, %v329_v11  ;;  %v337_v28 = vadd.f32 %v336_v20, %v335_v12  ;;  %v308_v29 = vrot.slane %v307_v21, 1 }
  0x59   : > { %v314_v30 = vrot.slane %v313_v22, 1  ;;  %v320_v31 = vrot.slane %v319_v23, 1  ;;  %v343_v32 = vadd.f32 %v342_v24, %v341_v16  ;;  %v273_v33 = vadd.f32 %v272_v53, %v1260_v35 }
  0x5a   : > { %v291_v34 = vadd.f32 %v290_v55, %v289_v40  ;;  %v326_v36 = vrot.slane %v325_v26, 1  ;;  %v338_v37 = vrot.slane %v337_v28, 1  ;;  %v285_v38 = vadd.f32 %v284_v54, %v1262_v39  ;;  %v232_v55 = vld [vmem:[#allocation2] sm:$0xff] }
  0x5b   : > { %v303_v41 = vadd.f32 %v302_v25, %v301_v17  ;;  %v332_v42 = vrot.slane %v331_v27, 1  ;;  %vm370_vm4 = vcmask 1045509   ;;  %v297_v43 = vadd.f32 %v296_v59, %v1265_v44 }
  0x5c   : > { %v315_v45 = vadd.f32 %v314_v30, %v313_v22  ;;  %v344_v46 = vrot.slane %v343_v32, 1  ;;  %v363_v47 = vsel %vm362_vm0, %v267_v58, %v255_v52  ;;  %v309_v48 = vadd.f32 %v308_v29, %v307_v21 }
  0x5d   : > { %v321_v49 = vadd.f32 %v320_v31, %v319_v23  ;;  %v327_v50 = vadd.f32 %v326_v36, %v325_v26  ;;  %v365_v51 = vsel %vm364_vm1, %v279_v61, %v363_v47  ;;  %v339_v35 = vadd.f32 %v338_v37, %v337_v28  ;;  %v233_v61 = vld [vmem:[#allocation2 + $0x8] sm:$0xff] }
  0x5e   : > { %v367_v40 = vsel %vm366_vm2, %v291_v34, %v365_v51  ;;  %vm372_vm5 = vcmask 1046534   ;;  %v376_v39 = vsel %vm362_vm0, %v273_v33, %v1276_v57  ;;  %v333_v53 = vadd.f32 %v332_v42, %v331_v27 }
  0x5f   : > { %v369_v54 = vsel %vm368_vm3, %v303_v41, %v367_v40  ;;  %vm374_vm6 = vcmask 1047559   ;;  %v377_v44 = vsel %vm364_vm1, %v285_v38, %v376_v39  ;;  %v345_v52 = vadd.f32 %v344_v46, %v343_v32 }
  0x60   : > { %v371_v56 = vsel %vm370_vm4, %v315_v45, %v369_v54  ;;  %v378_v58 = vsel %vm366_vm2, %v297_v43, %v377_v44 }
  0x61   : > { %v373_v59 = vsel %vm372_vm5, %v327_v50, %v371_v56  ;;  %v379_v60 = vsel %vm368_vm3, %v309_v48, %v378_v58 }
  0x62   : > { %v375_v62 = vsel %vm374_vm6, %v339_v35, %v373_v59  ;;  %v380_v63 = vsel %vm370_vm4, %v321_v49, %v379_v60 }
  0x63   : > { %v381_v57 = vsel %vm372_vm5, %v333_v53, %v380_v63  ;;  %v385_v0 = vadd.f32 %v375_v62, %v232_v55  ;;  %392 = sbr.rel (%p681_p1) target bundleno = 271 (0x10f), region = 48 }
  0x64   : > { %v382_v1 = vsel %vm374_vm6, %v345_v52, %v381_v57 }
  0x65   : > { %v386_v2 = vadd.f32 %v382_v1, %v233_v61  ;;  %387 = vst [vmem:[#allocation2] sm:$0xff] %v385_v0 }
  0x67   : > { %388 = vst [vmem:[#allocation2 + $0x8] sm:$0xff] %v386_v2 }
  0x68   : > { %v758_v3 = vld [vmem:[#allocation6 + $0x38] sm:$0xff]  ;;  %v757_v5 = vld [vmem:[#allocation6 + $0x30] sm:$0xff]  ;;  %v756_v7 = vld [vmem:[#allocation6 + $0x28] sm:$0xff] }
  0x69   : > { %v766_v4 = vld [vmem:[#allocation6 + $0x78] sm:$0xff]  ;;  %529 = vmatpush.bf16.msra.mxu0 %v758_v3  ;;  %v765_v6 = vld [vmem:[#allocation6 + $0x70] sm:$0xff]  ;;  %v764_v8 = vld [vmem:[#allocation6 + $0x68] sm:$0xff] }
  0x6a   : > { %542 = vmatpush.bf16.msra.mxu1 %v766_v4  ;;  %v755_v9 = vld [vmem:[#allocation6 + $0x20] sm:$0xff]  ;;  %v754_v11 = vld [vmem:[#allocation6 + $0x18] sm:$0xff]  ;;  %v753_v13 = vld [vmem:[#allocation6 + $0x10] sm:$0xff] }
  0x6b   : > { %v763_v10 = vld [vmem:[#allocation6 + $0x60] sm:$0xff]  ;;  %v762_v12 = vld [vmem:[#allocation6 + $0x58] sm:$0xff]  ;;  %v761_v14 = vld [vmem:[#allocation6 + $0x50] sm:$0xff] }
  0x6c   : > { %v752_v15 = vld [vmem:[#allocation6 + $0x8] sm:$0xff]  ;;  %v751_v17 = vld [vmem:[#allocation6] sm:$0xff]  ;;  %v393_v19 = vld [vmem:[#allocation2] sm:$0xff] }
  0x6d   : > { %530 = vmatpush.bf16.msra.mxu0 %v757_v5  ;;  %v760_v16 = vld [vmem:[#allocation6 + $0x48] sm:$0xff]  ;;  %v759_v18 = vld [vmem:[#allocation6 + $0x40] sm:$0xff]  ;;  %v395_v21 = vpack.c.bf16 %v393_v19, %v393_v19  ;;  %v886_v23 = vld [vmem:[%s1356_s2] ss:$0 sm:$0xff] }
  0x6e   : > { %543 = vmatpush.bf16.msra.mxu1 %v765_v6  ;;  %v394_v20 = vld [vmem:[#allocation2 + $0x8] sm:$0xff] }
  0x6f   : > { %v396_v22 = vpack.c.bf16 %v394_v20, %v394_v20 }
  0x71   : > { %531 = vmatpush.bf16.msra.mxu0 %v756_v7 }
  0x72   : > { %544 = vmatpush.bf16.msra.mxu1 %v764_v8 }
  0x75   : > { %532 = vmatpush.bf16.msra.mxu0 %v755_v9 }
  0x76   : > { %545 = vmatpush.bf16.msra.mxu1 %v763_v10 }
  0x79   : > { %533 = vmatpush.bf16.msra.mxu0 %v754_v11 }
  0x7a   : > { %546 = vmatpush.bf16.msra.mxu1 %v762_v12 }
  0x7d   : > { %534 = vmatpush.bf16.msra.mxu0 %v753_v13 }
  0x7e   : > { %547 = vmatpush.bf16.msra.mxu1 %v761_v14 }
  0x81   : > { %535 = vmatpush.bf16.msra.mxu0 %v752_v15 }
  0x82   : > { %548 = vmatpush.bf16.msra.mxu1 %v760_v16 }
  0x85   : > { %536 = vmatpush.bf16.msra.mxu0 %v751_v17 }
  0x86   : > { %549 = vmatpush.bf16.msra.mxu1 %v759_v18 }
  0x88   : > { %537 = vmatmul.bf16.vlgmr.msra.gmra.mxu0 %v395_v21 }
  0x89   : > { %550 = vmatmul.bf16.vlgmr.msra.gmra.mxu1 %v396_v22 }
 0x105   : > { %v538_v24 = vpop.f32.mrf.mxu0 }
 0x106   : > { %v551_v25 = vpop.f32.mrf.mxu1  ;;  %v539_v26 = vadd.f32 %v886_v23, %v538_v24 }
 0x108   : > { %v552_v27 = vadd.f32 %v551_v25, %v539_v26 }
 0x10a   : > { %555 = vst [vmem:[%s224_s20] sm:$0xff] %v552_v27 }
 0x10d   : > { %v540_v28 = vpop.f32.mrf.mxu0 }
 0x10e   : > { %v553_v29 = vpop.f32.mrf.mxu1 }
 0x10f PF: > { %s1382_s27 = sld [smem:[#allocation13_spill]]  ;;  %s569_s24 = sshll.u32 %s224_s20, 4  ;;  %s570_s24 = int_to_ptr.vmem [resolvable:$true] %s569_s24 }
 0x110   : > { %s1384_s5 = sld [smem:[#allocation20_spill]]  ;;  %s557_s8 = scalar_lea.sflag [#allocation5], %s222_s12 }
 0x115   : > { %s747_s6 = sshll.u32 %s1382_s27, 3 }
 0x116   : > { %s567_s9 = scalar_lea.hbm %s1384_s5, %s747_s6  ;;  %s967_s11 = scalar_lea.hbm %s1384_s5, 16 }
 0x117   : > { %s571_s7 = sshll.u32 %s567_s9, 4  ;;  %s572_s7 = int_to_ptr.hbm [resolvable:$true] %s571_s7 }
 0x118   : > { %s961_s26 = sshra.s32 %s572_s7, 4  ;;  %s962_s26 = int_to_ptr.hbm [resolvable:$true] %s961_s26 }
 0x119   : > { %s963_s23 = scalar_lea.hbm %s962_s26, 8  ;;  %p968_p4 = scmp.lt.s32.totalorder %s962_s26, %s1384_s5 }
 0x11a   : > { %p964_p3 = scmp.ne.s32.totalorder %s962_s26, %s963_s23  ;;  %p969_p5 = scmp.lt.s32.totalorder %s967_s11, %s963_s23 }
 0x11c   : > { %p965_p0 = pnand %p964_p3, %p1173_p7  ;;  %p970_p6 = por %p969_p5, %p968_p4 }
 0x11e   : > { %p966_p2 = pneg %p965_p0 }
 0x120   : > { %p971_p8 = pnand %p970_p6, %p966_p2 }
 0x122   : > { %974 = shalt.err (!%p971_p8)
}
 0x123   : > { %773 = dma.vmem_to_hbm [thread:$0]  (%p1173_p7), %s570_s24, 128, %s572_s7, %s557_s8  }
 0x124 PF: > { %s1385_s12 = sld [smem:[#allocation12_spill]]  ;;  %p790_p10 = scmp.ge.s32.totalorder %s1073_s22, 2 }
 0x126   : > { %p784_p12 = pnand %p790_p10, %p1178_p9 }
 0x128   : > { %p785_p13 = pneg %p784_p12 }
 0x12a   : > { %s583_s20 = sand.u32 1, %s1385_s12  }
 0x12b   : > { %s584_s25 = scalar_lea.sflag [#allocation5], %s583_s20 }
 0x12c   : > { %1028 = dma.done.wait (%p785_p13), %s584_s25, 128  }
 0x12d   : > { %1030 = vsyncadd (%p785_p13), %s584_s25, 4294967168  ;;  %s20_s22 = sadd.s32 1, %s1073_s22   ;;  %s1387_s18 = sld [smem:[#allocation14_spill]] }
 0x12e   : > { %p17_p11 = scmp.ge.s32.totalorder %s20_s22, 6   ;;  %s1388_s20 = sld [smem:[#allocation17_spill]] }
 0x12f   : > { %s1389_s27 = sld [smem:[#allocation18_spill]]  ;;  %s1390_s12 = smov %s1037_s13 }
 0x130   : > { %s1391_s13 = smov %s1041_s14  ;;  %s1392_s14 = smov %s1219_s10 }
 0x131   : > { %s1393_s15 = smov %s1049_s16  ;;  %s1394_s16 = smov %s1053_s17 }
 0x132   : > { %s1395_s17 = smov %s1222_s1  ;;  %s1396_s19 = smov %s1069_s21 }
 0x133   :  { %19 = sbr.rel (!%p17_p11) target bundleno = 13 (0xd), region = 89 }
 0x135   : > { %s1397_s21 = smov %s1389_s27 }
 0x138   :  { %590 = vsyncpa [#allocation4], 1 }
 0x139   :  { %592 = vsyncpa [#allocation4 + $0x1], 1 }
 0x13a   :  { %593 = vsyncpa [#allocation7], 1 }
 0x13b   :  { %594 = vsyncpa [#allocation5], 1 }
 0x13c   :  { %596 = vsyncpa [#allocation5 + $0x1], 1 }

</bundles_post_ra>
